<compile_context>
chip_gen: v7x
topology: tpu7x:2x2x1
jax: 0.10.0
libtpu: 0.0.40
codegen_flags: <defaults>
</compile_context>

<pallas_src>
import functools

import jax
import jax.numpy as jnp
from jax.experimental import pallas as pl
from jax.experimental.pallas import tpu as pltpu

_MAX_BLOCK_BYTES = 8 * 1024 * 1024    # per single input block
_VMEM_LIMIT_BYTES = 48 * 1024 * 1024  # 2 inputs x 2 bufs x 8 MiB = 32 MiB used


def _round_up(x, m):
    return (x + m - 1) // m * m


def _cdiv(a, b):
    return -(-a // b)


def _sublane_multiple(*dtypes):
    """Dtype-aware sublane rounding: 8 (>=32-bit), 16 (16-bit), 32 (8-bit)."""
    size = min(jnp.dtype(d).itemsize for d in dtypes)
    if size >= 4:
        return 8
    if size == 2:
        return 16
    return 32


def _choose_tiles(n, l, itemsize, sub):
    """Pick (row_block, l_block, num_splits, n_l_tiles, l_tiles_per_split)."""
    max_block_elems = max(sub * 128, _MAX_BLOCK_BYTES // itemsize)

    # Rows per block: full N when small (full-extent block is legal), else a
    # sublane-aligned chunk bounded so at least 128 lanes still fit the budget.
    rows_cap = max(sub, (max_block_elems // 128) // sub * sub)
    if n <= sub:
        row_block = n
    else:
        row_block = min(_round_up(n, sub), rows_cap)

    # Lanes per block: as much of L as the remaining budget allows (mult of 128).
    lane_cap = max(128, (max_block_elems // row_block) // 128 * 128)

    # Split the L sweep across 2 cores (v7x megacore) whenever each half still
    # gets at least one full 128-lane tile.
    num_splits = 2 if l >= 256 else 1
    if num_splits == 1:
        tl = l if l <= lane_cap else lane_cap            # full dim or 128-mult
    else:
        tl = min(lane_cap, _round_up(_cdiv(l, num_splits), 128))

    nt = _cdiv(l, tl)                 # total L tiles
    lt_per_split = _cdiv(nt, num_splits)
    return row_block, tl, num_splits, nt, lt_per_split


def _stats_kernel(p_ref, t_ref, st_out, tp_out, fp_out, fn_out,
                  st_acc, tp_acc, fp_acc, fn_acc,
                  *, l_total, l_block, lt_per_split, first_masked, need_mask):
    """Accumulate per-row sum(t), sum(p*t), sum(p*(1-t)), sum((1-p)*t)."""
    c = pl.program_id(0)              # L-range split (core-parallel on v7x)
    j = pl.program_id(2)              # L tile within this split (reduction)

    @pl.when(j == 0)
    def _init():
        st_acc[...] = jnp.zeros_like(st_acc)
        tp_acc[...] = jnp.zeros_like(tp_acc)
        fp_acc[...] = jnp.zeros_like(fp_acc)
        fn_acc[...] = jnp.zeros_like(fn_acc)

    p = p_ref[...].astype(jnp.float32)
    t = t_ref[...].astype(jnp.float32)

    def _accumulate(pp, tt):
        pt = pp * tt
        st_acc[...] += jnp.sum(tt, axis=1, keepdims=True)
        tp_acc[...] += jnp.sum(pt, axis=1, keepdims=True)
        # Direct FP/FN accumulation (p*(1-t) == p - p*t elementwise): avoids
        # cancellation of two large sums; extra subs hide under HBM DMA.
        fp_acc[...] += jnp.sum(pp - pt, axis=1, keepdims=True)
        fn_acc[...] += jnp.sum(tt - pt, axis=1, keepdims=True)

    if need_mask:
        gt = c * lt_per_split + j     # global L-tile index

        @pl.when(gt < first_masked)   # fully in-range tile: no mask work
        def _dense():
            _accumulate(p, t)

        @pl.when(gt >= first_masked)  # straddles / exceeds L: mask lanes
        def _ragged():
            lane = jax.lax.broadcasted_iota(jnp.int32, p.shape, dimension=1)
            valid = (gt * l_block + lane) < l_total
            _accumulate(jnp.where(valid, p, 0.0), jnp.where(valid, t, 0.0))
    else:
        _accumulate(p, t)

    @pl.when(j == pl.num_programs(2) - 1)
    def _finalize():
        st_out[...] = st_acc[...][None]
        tp_out[...] = tp_acc[...][None]
        fp_out[...] = fp_acc[...][None]
        fn_out[...] = fn_acc[...][None]


def _row_stats(preds_2d, trues_2d):
    """preds_2d/trues_2d: (N, L), any dtype.  Returns 4 f32 arrays of shape
    (num_splits, N, 1): per-row partial [sum(t), TP, FP, FN]."""
    n, l = preds_2d.shape
    p_item = jnp.dtype(preds_2d.dtype).itemsize
    t_item = jnp.dtype(trues_2d.dtype).itemsize
    itemsize = max(p_item, t_item)
    sub = _sublane_multiple(preds_2d.dtype, trues_2d.dtype)

    row_block, tl, num_splits, nt, lt_per_split = _choose_tiles(
        n, l, itemsize, sub)
    grid = (num_splits, pl.cdiv(n, row_block), lt_per_split)

    need_mask = (num_splits * lt_per_split * tl) > l
    first_masked = (l // tl) if (l % tl) else nt
    nt_minus_1 = nt - 1

    def in_map(c, i, j):
        # Clamp handles the (rare) duplicated trailing tile when nt is odd;
        # its contribution is masked to zero in the kernel.
        return (i, jnp.minimum(c * lt_per_split + j, nt_minus_1))

    def out_map(c, i, j):
        return (c, i, 0)

    out_struct = jax.ShapeDtypeStruct((num_splits, n, 1), jnp.float32)
    out_spec = pl.BlockSpec((1, row_block, 1), out_map)

    kernel = functools.partial(
        _stats_kernel, l_total=l, l_block=tl, lt_per_split=lt_per_split,
        first_masked=first_masked, need_mask=need_mask)

    cost = pl.CostEstimate(
        flops=6 * n * l,
        transcendentals=0,
        bytes_accessed=(p_item + t_item) * n * l + 4 * num_splits * n * 4)

    return pl.pallas_call(
        kernel,
        out_shape=(out_struct,) * 4,
        grid_spec=pltpu.PrefetchScalarGridSpec(
            num_scalar_prefetch=0,
            grid=grid,
            in_specs=[
                pl.BlockSpec((row_block, tl), in_map),
                pl.BlockSpec((row_block, tl), in_map),
            ],
            out_specs=(out_spec,) * 4,
            scratch_shapes=[pltpu.VMEM((row_block, 1), jnp.float32)] * 4,
        ),
        compiler_params=pltpu.CompilerParams(
            dimension_semantics=("parallel", "parallel", "arbitrary"),
            vmem_limit_bytes=_VMEM_LIMIT_BYTES,
        ),
        cost_estimate=cost,
    )(preds_2d, trues_2d)


@functools.partial(jax.jit, static_argnames=("beta",))
def fb_loss_forward(output, target, *, beta=1.0):
    """Matches FBLoss(beta).forward(output, target) for (B, C, ...) tensors."""
    b, c = output.shape[0], output.shape[1]
    n = b * c
    l = 1
    for d in output.shape[2:]:
        l *= d

    preds_2d = output.reshape(n, l)
    trues_2d = target.reshape(n, l)

    st, tp, fp, fn = _row_stats(preds_2d, trues_2d)   # (num_splits, N, 1) each
    st = jnp.sum(st, axis=0)[:, 0]
    tp = jnp.sum(tp, axis=0)[:, 0]
    fp = jnp.sum(fp, axis=0)[:, 0]
    fn = jnp.sum(fn, axis=0)[:, 0]

    smooth = 0.0001
    beta2 = beta * beta
    weights = jnp.clip(st, 0.0, 1.0)
    fb = ((1.0 + beta2) * tp + smooth) / (
        (1.0 + beta2) * tp + beta2 * fn + fp + smooth)
    score = jnp.sum(fb * weights) / (jnp.sum(weights) + smooth)
    score = jnp.clip(score, 0.0, 1.0)
    return 1.0 - score


def _reference(output, target, beta=1.0):
    """Pure-jnp mirror of the PyTorch fb_loss / FBLoss.forward."""
    b, c = output.shape[0], output.shape[1]
    p = output.reshape(b, c, -1).astype(jnp.float32)
    t = target.reshape(b, c, -1).astype(jnp.float32)
    smooth = 0.0001
    beta2 = beta * beta
    weights = jnp.clip(t.sum(-1), 0.0, 1.0)
    TP = (p * t).sum(2)
    FP = (p * (1 - t)).sum(2)
    FN = ((1 - p) * t).sum(2)
    Fb = ((1 + beta2) * TP + smooth) / ((1 + beta2) * TP + beta2 * FN + FP + smooth)
    score = jnp.clip((Fb * weights).sum() / (weights.sum() + smooth), 0.0, 1.0)
    return 1.0 - score


if __name__ == "__main__":
    key = jax.random.PRNGKey(0)
    k1, k2, k3, k4 = jax.random.split(key, 4)

    # 1) Nominal case (B, C, H, W) = (2, 4, 16, 16), f32.
    B, C, H, W = 2, 4, 16, 16
    output = jax.random.uniform(k1, (B, C, H, W), dtype=jnp.float32)
    target = jax.random.bernoulli(k2, 0.3, (B, C, H, W)).astype(jnp.float32)
    loss = jax.block_until_ready(fb_loss_forward(output, target, beta=1.0))
    ref = _reference(output, target, beta=1.0)
    assert jnp.allclose(loss, ref, atol=1e-4, rtol=1e-4), (loss, ref)

    # 2) Ragged spatial extent (17x17) -> exercises the gated L-tail mask and
    #    the 2-way core split, with beta != 1.
    B2, C2, H2, W2 = 2, 3, 17, 17
    out2 = jax.random.uniform(k3, (B2, C2, H2, W2), dtype=jnp.float32)
    tgt2 = jax.random.bernoulli(k4, 0.4, (B2, C2, H2, W2)).astype(jnp.float32)
    loss2 = jax.block_until_ready(fb_loss_forward(out2, tgt2, beta=2.0))
    ref2 = _reference(out2, tgt2, beta=2.0)
    assert jnp.allclose(loss2, ref2, atol=1e-4, rtol=1e-4), (loss2, ref2)

    # 3) bf16 inputs with N > sublane multiple -> dtype-aware row rounding and
    #    ragged row tail (dropped on writeback).
    B3, C3, H3, W3 = 3, 7, 16, 16
    out3 = jax.random.uniform(k1, (B3, C3, H3, W3),
                              dtype=jnp.float32).astype(jnp.bfloat16)
    tgt3 = jax.random.bernoulli(k2, 0.3, (B3, C3, H3, W3)).astype(jnp.bfloat16)
    loss3 = jax.block_until_ready(fb_loss_forward(out3, tgt3, beta=1.0))
    ref3 = _reference(out3, tgt3, beta=1.0)
    assert jnp.allclose(loss3, ref3, atol=1e-3, rtol=1e-3), (loss3, ref3)

    print("KERNEL_OK")
</pallas_src>

<mosaic_0001>
module attributes {stable_mosaic.version = 11 : i64} {
  func.func @_stats_kernel(%arg0: i32, %arg1: i32, %arg2: i32, %arg3: memref<8x128xf32, #tpu.memory_space<vmem>>, %arg4: memref<8x128xf32, #tpu.memory_space<vmem>>, %arg5: memref<1x8x1xf32, #tpu.memory_space<vmem>>, %arg6: memref<1x8x1xf32, #tpu.memory_space<vmem>>, %arg7: memref<1x8x1xf32, #tpu.memory_space<vmem>>, %arg8: memref<1x8x1xf32, #tpu.memory_space<vmem>>, %arg9: memref<8x1xf32, #tpu.memory_space<vmem>>, %arg10: memref<8x1xf32, #tpu.memory_space<vmem>>, %arg11: memref<8x1xf32, #tpu.memory_space<vmem>>, %arg12: memref<8x1xf32, #tpu.memory_space<vmem>>) attributes {dimension_semantics = [#tpu.dimension_semantics<parallel>, #tpu.dimension_semantics<parallel>, #tpu.dimension_semantics<arbitrary>], iteration_bounds = array<i64: 2, 1, 1>, scalar_prefetch = 0 : i64, scratch_operands = 4 : i64, tpu.core_type = #tpu.core_type<tc>, window_params = [{transform_indices = @transform_0, window_bounds = array<i64: 8, 128>}, {transform_indices = @transform_1, window_bounds = array<i64: 8, 128>}, {transform_indices = @transform_2, window_bounds = array<i64: 1, 8, 1>}, {transform_indices = @transform_3, window_bounds = array<i64: 1, 8, 1>}, {transform_indices = @transform_4, window_bounds = array<i64: 1, 8, 1>}, {transform_indices = @transform_5, window_bounds = array<i64: 1, 8, 1>}]} {
    %c0_i32 = arith.constant 0 : i32
    %0 = arith.cmpi eq, %arg2, %c0_i32 : i32
    %1 = arith.extui %0 : i1 to i32
    %c0_i32_0 = arith.constant 0 : i32
    %2 = arith.cmpi ne, %1, %c0_i32_0 : i32
    scf.if %2 {
      %cst_25 = arith.constant 0.000000e+00 : f32
      %31 = vector.broadcast %cst_25 : f32 to vector<8x1xf32>
      %c0_26 = arith.constant 0 : index
      %c0_27 = arith.constant 0 : index
      %32 = vector.load %arg9[%c0_26, %c0_27] : memref<8x1xf32, #tpu.memory_space<vmem>>, vector<8x1xf32>
      tpu.vector_store %arg9[%c0_26, %c0_27], %31 {strides = array<i32>} : memref<8x1xf32, #tpu.memory_space<vmem>>, vector<8x1xf32>,
      %cst_28 = arith.constant 0.000000e+00 : f32
      %33 = vector.broadcast %cst_28 : f32 to vector<8x1xf32>
      %c0_29 = arith.constant 0 : index
      %c0_30 = arith.constant 0 : index
      %34 = vector.load %arg10[%c0_29, %c0_30] : memref<8x1xf32, #tpu.memory_space<vmem>>, vector<8x1xf32>
      tpu.vector_store %arg10[%c0_29, %c0_30], %33 {strides = array<i32>} : memref<8x1xf32, #tpu.memory_space<vmem>>, vector<8x1xf32>,
      %cst_31 = arith.constant 0.000000e+00 : f32
      %35 = vector.broadcast %cst_31 : f32 to vector<8x1xf32>
      %c0_32 = arith.constant 0 : index
      %c0_33 = arith.constant 0 : index
      %36 = vector.load %arg11[%c0_32, %c0_33] : memref<8x1xf32, #tpu.memory_space<vmem>>, vector<8x1xf32>
      tpu.vector_store %arg11[%c0_32, %c0_33], %35 {strides = array<i32>} : memref<8x1xf32, #tpu.memory_space<vmem>>, vector<8x1xf32>,
      %cst_34 = arith.constant 0.000000e+00 : f32
      %37 = vector.broadcast %cst_34 : f32 to vector<8x1xf32>
      %c0_35 = arith.constant 0 : index
      %c0_36 = arith.constant 0 : index
      %38 = vector.load %arg12[%c0_35, %c0_36] : memref<8x1xf32, #tpu.memory_space<vmem>>, vector<8x1xf32>
      tpu.vector_store %arg12[%c0_35, %c0_36], %37 {strides = array<i32>} : memref<8x1xf32, #tpu.memory_space<vmem>>, vector<8x1xf32>,
    } else {
    }
    %c0 = arith.constant 0 : index
    %c0_1 = arith.constant 0 : index
    %3 = vector.load %arg3[%c0, %c0_1] : memref<8x128xf32, #tpu.memory_space<vmem>>, vector<8x128xf32>
    %c0_2 = arith.constant 0 : index
    %c0_3 = arith.constant 0 : index
    %4 = vector.load %arg4[%c0_2, %c0_3] : memref<8x128xf32, #tpu.memory_space<vmem>>, vector<8x128xf32>
    %5 = arith.mulf %3, %4 : vector<8x128xf32>
    %c0_4 = arith.constant 0 : index
    %c0_5 = arith.constant 0 : index
    %6 = vector.load %arg9[%c0_4, %c0_5] : memref<8x1xf32, #tpu.memory_space<vmem>>, vector<8x1xf32>
    %cst = arith.constant dense<0.000000e+00> : vector<8xf32>
    %7 = vector.multi_reduction <add>, %4, %cst [1] : vector<8x128xf32> to vector<8xf32>
    %8 = vector.shape_cast %7 : vector<8xf32> to vector<8x1xf32>
    %9 = arith.addf %6, %8 : vector<8x1xf32>
    %c0_6 = arith.constant 0 : index
    %c0_7 = arith.constant 0 : index
    %10 = vector.load %arg9[%c0_6, %c0_7] : memref<8x1xf32, #tpu.memory_space<vmem>>, vector<8x1xf32>
    tpu.vector_store %arg9[%c0_6, %c0_7], %9 {strides = array<i32>} : memref<8x1xf32, #tpu.memory_space<vmem>>, vector<8x1xf32>,
    %c0_8 = arith.constant 0 : index
    %c0_9 = arith.constant 0 : index
    %11 = vector.load %arg10[%c0_8, %c0_9] : memref<8x1xf32, #tpu.memory_space<vmem>>, vector<8x1xf32>
    %cst_10 = arith.constant dense<0.000000e+00> : vector<8xf32>
    %12 = vector.multi_reduction <add>, %5, %cst_10 [1] : vector<8x128xf32> to vector<8xf32>
    %13 = vector.shape_cast %12 : vector<8xf32> to vector<8x1xf32>
    %14 = arith.addf %11, %13 : vector<8x1xf32>
    %c0_11 = arith.constant 0 : index
    %c0_12 = arith.constant 0 : index
    %15 = vector.load %arg10[%c0_11, %c0_12] : memref<8x1xf32, #tpu.memory_space<vmem>>, vector<8x1xf32>
    tpu.vector_store %arg10[%c0_11, %c0_12], %14 {strides = array<i32>} : memref<8x1xf32, #tpu.memory_space<vmem>>, vector<8x1xf32>,
    %c0_13 = arith.constant 0 : index
    %c0_14 = arith.constant 0 : index
    %16 = vector.load %arg11[%c0_13, %c0_14] : memref<8x1xf32, #tpu.memory_space<vmem>>, vector<8x1xf32>
    %17 = arith.subf %3, %5 : vector<8x128xf32>
    %cst_15 = arith.constant dense<0.000000e+00> : vector<8xf32>
    %18 = vector.multi_reduction <add>, %17, %cst_15 [1] : vector<8x128xf32> to vector<8xf32>
    %19 = vector.shape_cast %18 : vector<8xf32> to vector<8x1xf32>
    %20 = arith.addf %16, %19 : vector<8x1xf32>
    %c0_16 = arith.constant 0 : index
    %c0_17 = arith.constant 0 : index
    %21 = vector.load %arg11[%c0_16, %c0_17] : memref<8x1xf32, #tpu.memory_space<vmem>>, vector<8x1xf32>
    tpu.vector_store %arg11[%c0_16, %c0_17], %20 {strides = array<i32>} : memref<8x1xf32, #tpu.memory_space<vmem>>, vector<8x1xf32>,
    %c0_18 = arith.constant 0 : index
    %c0_19 = arith.constant 0 : index
    %22 = vector.load %arg12[%c0_18, %c0_19] : memref<8x1xf32, #tpu.memory_space<vmem>>, vector<8x1xf32>
    %23 = arith.subf %4, %5 : vector<8x128xf32>
    %cst_20 = arith.constant dense<0.000000e+00> : vector<8xf32>
    %24 = vector.multi_reduction <add>, %23, %cst_20 [1] : vector<8x128xf32> to vector<8xf32>
    %25 = vector.shape_cast %24 : vector<8xf32> to vector<8x1xf32>
    %26 = arith.addf %22, %25 : vector<8x1xf32>
    %c0_21 = arith.constant 0 : index
    %c0_22 = arith.constant 0 : index
    %27 = vector.load %arg12[%c0_21, %c0_22] : memref<8x1xf32, #tpu.memory_space<vmem>>, vector<8x1xf32>
    tpu.vector_store %arg12[%c0_21, %c0_22], %26 {strides = array<i32>} : memref<8x1xf32, #tpu.memory_space<vmem>>, vector<8x1xf32>,
    %c0_i32_23 = arith.constant 0 : i32
    %28 = arith.cmpi eq, %arg2, %c0_i32_23 : i32
    %29 = arith.extui %28 : i1 to i32
    %c0_i32_24 = arith.constant 0 : i32
    %30 = arith.cmpi ne, %29, %c0_i32_24 : i32
    scf.if %30 {
      %c0_25 = arith.constant 0 : index
      %c0_26 = arith.constant 0 : index
      %31 = vector.load %arg9[%c0_25, %c0_26] : memref<8x1xf32, #tpu.memory_space<vmem>>, vector<8x1xf32>
      %32 = vector.shape_cast %31 : vector<8x1xf32> to vector<1x8x1xf32>
      %c0_27 = arith.constant 0 : index
      %c0_28 = arith.constant 0 : index
      %c0_29 = arith.constant 0 : index
      %33 = vector.load %arg5[%c0_27, %c0_28, %c0_29] : memref<1x8x1xf32, #tpu.memory_space<vmem>>, vector<1x8x1xf32>
      tpu.vector_store %arg5[%c0_27, %c0_28, %c0_29], %32 {strides = array<i32>} : memref<1x8x1xf32, #tpu.memory_space<vmem>>, vector<1x8x1xf32>,
      %c0_30 = arith.constant 0 : index
      %c0_31 = arith.constant 0 : index
      %34 = vector.load %arg10[%c0_30, %c0_31] : memref<8x1xf32, #tpu.memory_space<vmem>>, vector<8x1xf32>
      %35 = vector.shape_cast %34 : vector<8x1xf32> to vector<1x8x1xf32>
      %c0_32 = arith.constant 0 : index
      %c0_33 = arith.constant 0 : index
      %c0_34 = arith.constant 0 : index
      %36 = vector.load %arg6[%c0_32, %c0_33, %c0_34] : memref<1x8x1xf32, #tpu.memory_space<vmem>>, vector<1x8x1xf32>
      tpu.vector_store %arg6[%c0_32, %c0_33, %c0_34], %35 {strides = array<i32>} : memref<1x8x1xf32, #tpu.memory_space<vmem>>, vector<1x8x1xf32>,
      %c0_35 = arith.constant 0 : index
      %c0_36 = arith.constant 0 : index
      %37 = vector.load %arg11[%c0_35, %c0_36] : memref<8x1xf32, #tpu.memory_space<vmem>>, vector<8x1xf32>
      %38 = vector.shape_cast %37 : vector<8x1xf32> to vector<1x8x1xf32>
      %c0_37 = arith.constant 0 : index
      %c0_38 = arith.constant 0 : index
      %c0_39 = arith.constant 0 : index
      %39 = vector.load %arg7[%c0_37, %c0_38, %c0_39] : memref<1x8x1xf32, #tpu.memory_space<vmem>>, vector<1x8x1xf32>
      tpu.vector_store %arg7[%c0_37, %c0_38, %c0_39], %38 {strides = array<i32>} : memref<1x8x1xf32, #tpu.memory_space<vmem>>, vector<1x8x1xf32>,
      %c0_40 = arith.constant 0 : index
      %c0_41 = arith.constant 0 : index
      %40 = vector.load %arg12[%c0_40, %c0_41] : memref<8x1xf32, #tpu.memory_space<vmem>>, vector<8x1xf32>
      %41 = vector.shape_cast %40 : vector<8x1xf32> to vector<1x8x1xf32>
      %c0_42 = arith.constant 0 : index
      %c0_43 = arith.constant 0 : index
      %c0_44 = arith.constant 0 : index
      %42 = vector.load %arg8[%c0_42, %c0_43, %c0_44] : memref<1x8x1xf32, #tpu.memory_space<vmem>>, vector<1x8x1xf32>
      tpu.vector_store %arg8[%c0_42, %c0_43, %c0_44], %41 {strides = array<i32>} : memref<1x8x1xf32, #tpu.memory_space<vmem>>, vector<1x8x1xf32>,
    } else {
    }
    return
  }
  func.func @transform_0(%arg0: i32, %arg1: i32, %arg2: i32) -> (i32, i32) {
    %c1_i32 = arith.constant 1 : i32
    %0 = arith.muli %arg0, %c1_i32 : i32
    %1 = arith.addi %0, %arg2 : i32
    %c1_i32_0 = arith.constant 1 : i32
    %2 = arith.minsi %1, %c1_i32_0 : i32
    %c0_i32 = arith.constant 0 : i32
    return %arg1, %2 : i32, i32
  }
  func.func @transform_1(%arg0: i32, %arg1: i32, %arg2: i32) -> (i32, i32) {
    %c1_i32 = arith.constant 1 : i32
    %0 = arith.muli %arg0, %c1_i32 : i32
    %1 = arith.addi %0, %arg2 : i32
    %c1_i32_0 = arith.constant 1 : i32
    %2 = arith.minsi %1, %c1_i32_0 : i32
    %c0_i32 = arith.constant 0 : i32
    return %arg1, %2 : i32, i32
  }
  func.func @transform_2(%arg0: i32, %arg1: i32, %arg2: i32) -> (i32, i32, i32) {
    %c0_i32 = arith.constant 0 : i32
    %c0_i32_0 = arith.constant 0 : i32
    return %arg0, %arg1, %c0_i32 : i32, i32, i32
  }
  func.func @transform_3(%arg0: i32, %arg1: i32, %arg2: i32) -> (i32, i32, i32) {
    %c0_i32 = arith.constant 0 : i32
    %c0_i32_0 = arith.constant 0 : i32
    return %arg0, %arg1, %c0_i32 : i32, i32, i32
  }
  func.func @transform_4(%arg0: i32, %arg1: i32, %arg2: i32) -> (i32, i32, i32) {
    %c0_i32 = arith.constant 0 : i32
    %c0_i32_0 = arith.constant 0 : i32
    return %arg0, %arg1, %c0_i32 : i32, i32, i32
  }
  func.func @transform_5(%arg0: i32, %arg1: i32, %arg2: i32) -> (i32, i32, i32) {
    %c0_i32 = arith.constant 0 : i32
    %c0_i32_0 = arith.constant 0 : i32
    return %arg0, %arg1, %c0_i32 : i32, i32, i32
  }
}

</mosaic_0001>

<bundles_post_ra>
// kernel: fb_loss_forward.1
= control target key start
LH: loop header
LB: loop body
LE: loop exit
PB: predicated region body
PF: predicated region fallthrough
CT: control target
= control target key end

     0   :  { %s755_s18 = smov 0   ;;  %s757_s19 = smov 0   ;;  %s812_s0 = inlined_call_operand.vmem [shape: f32[8,256], index: 0, kind: input, shape index: {}]   ;;  %s813_s1 = inlined_call_operand.vmem [shape: f32[8,256], index: 1, kind: input, shape index: {}]   ;;  %s814_s2 = inlined_call_operand.vmem [shape: f32[2,8,1], index: 2, kind: output, shape index: {0}]   ;;  %s815_s3 = inlined_call_operand.vmem [shape: f32[2,8,1], index: 3, kind: output, shape index: {1}]   ;;  %s816_s4 = inlined_call_operand.vmem [shape: f32[2,8,1], index: 4, kind: output, shape index: {2}]   ;;  %s817_s5 = inlined_call_operand.vmem [shape: f32[2,8,1], index: 5, kind: output, shape index: {3}]  }
   0x1   :  { %s759_s20 = smov 0  }
   0x2 LB: > { %s35_s21 = sadd.s32 1, %s718_s19  ;;  %p660_p0 = scmp.ge.s32.totalorder %s722_s20, 1  ;;  %s722_s20 = sphi %s759_s20, %s16_s20   ;;  %s718_s19 = sphi %s757_s19, %s819_s19   ;;  %s714_s18 = sphi %s755_s18, %s818_s18  }
   0x3   : > { %p37_p1 = scmp.ge.s32.totalorder %s35_s21, 2  ;;  %p265_p2 = scmp.lt.s32.totalorder %s722_s20, 3 }
   0x5   : > { %s821_s21 = smov (%p37_p1, %s35_s21), 0  ;;  %p266_p3 = pnand %p660_p0, %p265_p2 }
   0x6   : > { %p334_p4 = scmp.lt.s32.totalorder (!%p266_p3), %s714_s18, 1  ;;  %vm393_vm0 = vcmask (!%p266_p3), 7168   ;;  %v724_v0 = vmov (!%p266_p3), 0.0  }
   0x7   : > { %269 = sbr.rel (%p266_p3) target bundleno = 182 (0xb6), region = 28  ;;  %394 = vst.msk [vmem:[#allocation2] sm:$0xff] (!%p266_p3), %vm393_vm0, %v724_v0  ;;  %395 = vst.msk [vmem:[#allocation3] sm:$0xff] (!%p266_p3), %vm393_vm0, %v724_v0 }
   0x8   : > { %396 = vst.msk [vmem:[#allocation4] sm:$0xff] (!%p266_p3), %vm393_vm0, %v724_v0  ;;  %397 = vst.msk [vmem:[#allocation5] sm:$0xff] (!%p266_p3), %vm393_vm0, %v724_v0 }
   0xe   : > { %s823_s18 = smov (!%p334_p4, %s714_s18), 1  ;;  %v401_v6 = vld [vmem:[#allocation2] sm:$0xff]  ;;  %v407_v9 = vld [vmem:[#allocation3] sm:$0xff] }
   0xf   : > { %s339_s22 = scalar_select %p334_p4, %s823_s18, 1  ;;  %v412_v10 = vld [vmem:[#allocation4] sm:$0xff]  ;;  %v418_v15 = vld [vmem:[#allocation5] sm:$0xff] }
  0x10   : > { %s669_s30 = sshll.u32 %s823_s18, 3 }
  0x11   : > { %s664_s23 = sshll.u32 %s339_s22, 3  ;;  %s367_s8 = scalar_lea.vmem %s814_s2, %s669_s30 }
  0x12   : > { %s357_s26 = scalar_lea.vmem %s813_s1, %s664_s23  ;;  %s343_s29 = scalar_lea.vmem %s812_s0, %s664_s23 }
  0x13   : > { %v399_v1 = vld [vmem:[%s357_s26] sm:$0xff]  ;;  %s374_s11 = scalar_lea.vmem %s815_s3, %s669_s30  ;;  %s381_s14 = scalar_lea.vmem %s816_s4, %s669_s30 }
  0x14   : > { %402 = vadd.xlane.f32.xlu0 %v399_v1  ;;  %v398_v2 = vld [vmem:[%s343_s29] sm:$0xff]  ;;  %s388_s17 = scalar_lea.vmem %s817_s5, %s669_s30 }
  0x15   : > { %v400_v3 = vmul.f32 %v399_v1, %v398_v2 }
  0x17   : > { %v413_v4 = vsub.f32 %v398_v2, %v400_v3  ;;  %v419_v5 = vsub.f32 %v399_v1, %v400_v3 }
  0x18   : > { %408 = vadd.xlane.f32.xlu0 %v400_v3 }
  0x19   : > { %414 = vadd.xlane.f32.xlu1 %v413_v4 }
  0x1d   : > { %420 = vadd.xlane.f32.xlu1 %v419_v5 }
  0xa1   : > { %v403_v7 = vpop.xlane.xlu0 %402 }
  0xa2   : > { %v404_v8 = vadd.f32 %v403_v7, %v401_v6 }
  0xa4   : > { %406 = vst.msk [vmem:[#allocation2] sm:$0xff] %vm393_vm0, %v404_v8 }
  0xa5   : > { %v409_v11 = vpop.xlane.xlu0 %408 }
  0xa6   : > { %v410_v12 = vadd.f32 %v409_v11, %v407_v9  ;;  %v415_v13 = vpop.xlane.xlu1 %414 }
  0xa7   : > { %v416_v14 = vadd.f32 %v415_v13, %v412_v10 }
  0xa8   : > { %411 = vst.msk [vmem:[#allocation3] sm:$0xff] %vm393_vm0, %v410_v12 }
  0xa9   : > { %417 = vst.msk [vmem:[#allocation4] sm:$0xff] %vm393_vm0, %v416_v14 }
  0xaa   : > { %v421_v17 = vpop.xlane.xlu1 %420 }
  0xab   : > { %v427_v16 = vld [vmem:[#allocation2] sm:$0xff]  ;;  %v422_v18 = vadd.f32 %v421_v17, %v418_v15 }
  0xac   : > { %428 = vst.msk [vmem:[%s367_s8] sm:$0xff] %vm393_vm0, %v427_v16 }
  0xad   : > { %423 = vst.msk [vmem:[#allocation5] sm:$0xff] %vm393_vm0, %v422_v18 }
  0xaf   : > { %v429_v19 = vld [vmem:[#allocation3] sm:$0xff] }
  0xb0   : > { %430 = vst.msk [vmem:[%s374_s11] sm:$0xff] %vm393_vm0, %v429_v19  ;;  %v431_v20 = vld [vmem:[#allocation4] sm:$0xff] }
  0xb1   : > { %432 = vst.msk [vmem:[%s381_s14] sm:$0xff] %vm393_vm0, %v431_v20 }
  0xb4   : > { %v433_v21 = vld [vmem:[#allocation5] sm:$0xff] }
  0xb5   : > { %434 = vst.msk [vmem:[%s388_s17] sm:$0xff] %vm393_vm0, %v433_v21 }
  0xb6 PF: > { %s16_s20 = sadd.s32 1, %s722_s20   ;;  %s818_s18 = smov %s718_s19 }
  0xb7   : > { %p13_p5 = scmp.ge.s32.totalorder %s16_s20, 4   ;;  %s819_s19 = smov %s821_s21 }
  0xb9   :  { %15 = sbr.rel (!%p13_p5) target bundleno = 2 (0x2), region = 105 }

</bundles_post_ra>
